<compile_context>
chip_gen: v7x
topology: tpu7x:2x2x1
jax: 0.10.0
libtpu: 0.0.40
codegen_flags: <defaults>
</compile_context>

<pallas_src>
import functools

import jax
import jax.numpy as jnp
from jax import lax
from jax.experimental import pallas as pl
from jax.experimental.pallas import tpu as pltpu


_VMEM_LIMIT_BYTES = 48 * 1024 * 1024      # safe on v5e/v6e (128 MiB) and v7x (64 MiB)
_FAST_PATH_BYTES = 4 * 1024 * 1024        # whole-slab path if f32 slab (sublane-padded) <= 4 MiB
_TILE_BYTES = 2 * 1024 * 1024             # target per-tile VMEM bytes for the streamed path


def _round_up(a, b):
    return ((a + b - 1) // b) * b


def _cdiv(a, b):
    return -(-a // b)


# --------------------------------------------------------------------------
# Fast path: whole (1, C, T) slab per grid step, fused single-pass reduction.
# --------------------------------------------------------------------------
def _gcln_fused_kernel(x_ref, gamma_ref, beta_ref, o_ref, *, eps, inv_count):
    xf = x_ref[...].astype(jnp.float32)                 # (1, C, T)
    s = jnp.sum(xf)
    ss = jnp.sum(xf * xf)
    mean = s * inv_count
    var = jnp.maximum(ss * inv_count - mean * mean, 0.0)
    inv_std = lax.rsqrt(var + eps)
    g = gamma_ref[...].astype(jnp.float32)[None]        # (1, C, 1)
    b = beta_ref[...].astype(jnp.float32)[None]         # (1, C, 1)
    scale = g * inv_std                                 # gamma / sqrt(var+eps)
    shift = b - mean * scale                            # beta - mean*scale
    o_ref[...] = (xf * scale + shift).astype(o_ref.dtype)


# --------------------------------------------------------------------------
# Streamed path, pass 1: per-sample sum / sum-of-squares over T tiles.
# Output blocks (1,1,1) stay resident across the "arbitrary" T axis.
# The ragged last tile is masked with an iota (OOB input reads are garbage).
# --------------------------------------------------------------------------
def _gcln_reduce_kernel(x_ref, sum_ref, ssq_ref, *, tile_t, valid_t, need_mask):
    t = pl.program_id(1)

    @pl.when(t == 0)
    def _():
        sum_ref[...] = jnp.zeros_like(sum_ref)
        ssq_ref[...] = jnp.zeros_like(ssq_ref)

    xf = x_ref[...].astype(jnp.float32)                 # (1, C, tile_t)
    if need_mask:
        col = t * tile_t + lax.broadcasted_iota(jnp.int32, xf.shape, 2)
        xf = jnp.where(col < valid_t, xf, 0.0)
    sum_ref[...] += jnp.sum(xf)
    ssq_ref[...] += jnp.sum(xf * xf)


# --------------------------------------------------------------------------
# Streamed path, pass 2: y = x * scale + shift with precombined per-channel
# scale/shift (shape (1, C, 1) per sample).  OOB columns of the last tile are
# computed on garbage but dropped by Pallas' masked output writeback.
# --------------------------------------------------------------------------
def _gcln_scale_shift_kernel(x_ref, scale_ref, shift_ref, o_ref):
    xf = x_ref[...].astype(jnp.float32)                 # (1, C, tile_t)
    o_ref[...] = (xf * scale_ref[...] + shift_ref[...]).astype(o_ref.dtype)


def global_channel_layer_norm(x, gamma=None, beta=None, eps=1e-05, *,
                              fast_path_bytes=_FAST_PATH_BYTES, tile_t=None):
    """gLN forward. x: (N, C, T); gamma/beta: (C, 1) (None -> ones/zeros)."""
    N, C, T = x.shape
    if gamma is None:
        gamma = jnp.ones((C, 1), jnp.float32)
    if beta is None:
        beta = jnp.zeros((C, 1), jnp.float32)
    gamma = gamma.reshape(C, 1)
    beta = beta.reshape(C, 1)
    eps = float(eps)
    count = float(C * T)

    itemsize = jnp.dtype(x.dtype).itemsize
    # Sublane padding of the second-minor axis (f32 -> 8, bf16 -> 16, i8 -> 32).
    sublane = max(8, 32 // itemsize)
    c_pad = _round_up(C, sublane)

    # ---------------- Fast path: whole slab fits comfortably in VMEM --------
    if c_pad * T * 4 <= fast_path_bytes and tile_t is None:
        kernel = functools.partial(_gcln_fused_kernel, eps=eps,
                                   inv_count=1.0 / count)
        return pl.pallas_call(
            kernel,
            out_shape=jax.ShapeDtypeStruct((N, C, T), x.dtype),
            grid_spec=pltpu.PrefetchScalarGridSpec(
                num_scalar_prefetch=0,
                grid=(N,),
                in_specs=[
                    pl.BlockSpec((1, C, T), lambda n: (n, 0, 0)),
                    pl.BlockSpec((C, 1), lambda n: (0, 0)),
                    pl.BlockSpec((C, 1), lambda n: (0, 0)),
                ],
                out_specs=pl.BlockSpec((1, C, T), lambda n: (n, 0, 0)),
            ),
            compiler_params=pltpu.CompilerParams(
                dimension_semantics=("parallel",),
                vmem_limit_bytes=_VMEM_LIMIT_BYTES,
            ),
        )(x, gamma, beta)

    # ---------------- Streamed path: tile the T axis -----------------------
    if tile_t is None:
        cand = (_TILE_BYTES // max(1, c_pad * itemsize)) // 128 * 128
        tile_t = max(128, cand)
    else:
        tile_t = max(128, _round_up(int(tile_t), 128))
    tile_t = min(tile_t, _round_up(T, 128))
    n_t = _cdiv(T, tile_t)
    need_mask = (T % tile_t) != 0

    # Pass 1: per-sample sum and sum-of-squares (ragged last tile masked).
    reduce_kernel = functools.partial(_gcln_reduce_kernel, tile_t=tile_t,
                                      valid_t=T, need_mask=need_mask)
    sums, ssqs = pl.pallas_call(
        reduce_kernel,
        out_shape=(jax.ShapeDtypeStruct((N, 1, 1), jnp.float32),
                   jax.ShapeDtypeStruct((N, 1, 1), jnp.float32)),
        grid_spec=pltpu.PrefetchScalarGridSpec(
            num_scalar_prefetch=0,
            grid=(N, n_t),
            in_specs=[pl.BlockSpec((1, C, tile_t), lambda n, t: (n, 0, t))],
            out_specs=[pl.BlockSpec((1, 1, 1), lambda n, t: (n, 0, 0)),
                       pl.BlockSpec((1, 1, 1), lambda n, t: (n, 0, 0))],
        ),
        compiler_params=pltpu.CompilerParams(
            dimension_semantics=("parallel", "arbitrary"),
            vmem_limit_bytes=_VMEM_LIMIT_BYTES,
        ),
    )(x)

    # Fold mean / inv_std and the affine into per-(sample, channel) scale/shift
    # (tiny (N, C) arrays -> plain JAX).
    mean = sums[:, 0, 0] / count                                     # (N,)
    var = jnp.maximum(ssqs[:, 0, 0] / count - mean * mean, 0.0)      # (N,)
    inv_std = lax.rsqrt(var + eps)                                   # (N,)
    gamma_f = gamma.astype(jnp.float32).reshape(1, C)
    beta_f = beta.astype(jnp.float32).reshape(1, C)
    scale = gamma_f * inv_std[:, None]                               # (N, C)
    shift = beta_f - mean[:, None] * scale                           # (N, C)
    scale = scale.reshape(N, C, 1)
    shift = shift.reshape(N, C, 1)

    # Pass 2: stream x tiles again, y = x*scale + shift (lane-dense tiles,
    # ragged last tile handled by masked output writeback).
    out = pl.pallas_call(
        _gcln_scale_shift_kernel,
        out_shape=jax.ShapeDtypeStruct((N, C, T), x.dtype),
        grid_spec=pltpu.PrefetchScalarGridSpec(
            num_scalar_prefetch=0,
            grid=(N, n_t),
            in_specs=[
                pl.BlockSpec((1, C, tile_t), lambda n, t: (n, 0, t)),
                pl.BlockSpec((1, C, 1), lambda n, t: (n, 0, 0)),
                pl.BlockSpec((1, C, 1), lambda n, t: (n, 0, 0)),
            ],
            out_specs=pl.BlockSpec((1, C, tile_t), lambda n, t: (n, 0, t)),
        ),
        compiler_params=pltpu.CompilerParams(
            dimension_semantics=("parallel", "parallel"),
            vmem_limit_bytes=_VMEM_LIMIT_BYTES,
        ),
    )(x, scale, shift)
    return out


def reference_gcln(x, gamma, beta, eps=1e-05):
    xf = x.astype(jnp.float32)
    mean = jnp.mean(xf, axis=(1, 2), keepdims=True)
    var = jnp.mean((xf - mean) ** 2, axis=(1, 2), keepdims=True)
    y = gamma[None] * (xf - mean) / jnp.sqrt(var + eps) + beta[None]
    return y.astype(x.dtype)


if __name__ == "__main__":
    key = jax.random.PRNGKey(0)
    k1, k2 = jax.random.split(key)

    # --- Test 1: small shape (whole-slab fast path), matches module defaults.
    N, C, T = 2, 4, 16
    x = jax.random.normal(k1, (N, C, T), dtype=jnp.float32)
    gamma = jnp.ones((C, 1), dtype=jnp.float32)   # GlobalChannelLayerNorm init
    beta = jnp.zeros((C, 1), dtype=jnp.float32)
    out = jax.block_until_ready(global_channel_layer_norm(x, gamma, beta, eps=1e-05))
    ref = reference_gcln(x, gamma, beta, eps=1e-05)
    assert out.shape == (N, C, T)
    assert jnp.allclose(out, ref, atol=1e-4, rtol=1e-4), float(jnp.max(jnp.abs(out - ref)))

    # --- Test 2: force the T-tiled streamed path (ragged last tile, masking).
    N2, C2, T2 = 2, 8, 300
    x2 = jax.random.normal(k2, (N2, C2, T2), dtype=jnp.float32)
    gamma2 = 1.0 + 0.1 * jax.random.normal(jax.random.PRNGKey(1), (C2, 1), dtype=jnp.float32)
    beta2 = 0.1 * jax.random.normal(jax.random.PRNGKey(2), (C2, 1), dtype=jnp.float32)
    out2 = jax.block_until_ready(
        global_channel_layer_norm(x2, gamma2, beta2, eps=1e-05,
                                  fast_path_bytes=0, tile_t=128))
    ref2 = reference_gcln(x2, gamma2, beta2, eps=1e-05)
    assert out2.shape == (N2, C2, T2)
    assert jnp.allclose(out2, ref2, atol=1e-4, rtol=1e-4), float(jnp.max(jnp.abs(out2 - ref2)))

    # --- Test 3: elementwise_affine=False branch (gamma/beta default).
    x3 = jax.random.normal(jax.random.PRNGKey(3), (1, 4, 16), dtype=jnp.float32)
    out3 = jax.block_until_ready(global_channel_layer_norm(x3, None, None, eps=1e-05))
    ref3 = reference_gcln(x3, jnp.ones((4, 1), jnp.float32), jnp.zeros((4, 1), jnp.float32))
    assert jnp.allclose(out3, ref3, atol=1e-4, rtol=1e-4), float(jnp.max(jnp.abs(out3 - ref3)))

    print("KERNEL_OK")
</pallas_src>

<mosaic_0001>
module attributes {stable_mosaic.version = 11 : i64} {
  func.func @_gcln_fused_kernel(%arg0: i32, %arg1: memref<1x4x16xf32, #tpu.memory_space<vmem>>, %arg2: memref<4x1xf32, #tpu.memory_space<vmem>>, %arg3: memref<4x1xf32, #tpu.memory_space<vmem>>, %arg4: memref<1x4x16xf32, #tpu.memory_space<vmem>>) attributes {dimension_semantics = [#tpu.dimension_semantics<parallel>], iteration_bounds = array<i64: 2>, scalar_prefetch = 0 : i64, scratch_operands = 0 : i64, tpu.core_type = #tpu.core_type<tc>, window_params = [{transform_indices = @transform_0, window_bounds = array<i64: 1, 4, 16>}, {pipeline_mode = #tpu.pipeline_mode<synchronous>, transform_indices = @transform_1, window_bounds = array<i64: 4, 1>}, {pipeline_mode = #tpu.pipeline_mode<synchronous>, transform_indices = @transform_2, window_bounds = array<i64: 4, 1>}, {transform_indices = @transform_3, window_bounds = array<i64: 1, 4, 16>}]} {
    %c0 = arith.constant 0 : index
    %c0_0 = arith.constant 0 : index
    %c0_1 = arith.constant 0 : index
    %0 = vector.load %arg1[%c0, %c0_0, %c0_1] : memref<1x4x16xf32, #tpu.memory_space<vmem>>, vector<1x4x16xf32>
    %1 = vector.shape_cast %0 : vector<1x4x16xf32> to vector<1x1x4x16xf32>
    %cst = arith.constant dense<0.000000e+00> : vector<1xf32>
    %2 = vector.multi_reduction <add>, %1, %cst [1, 2, 3] : vector<1x1x4x16xf32> to vector<1xf32>
    %3 = vector.shape_cast %2 : vector<1xf32> to vector<1x1x1x1xf32>
    %4 = vector.extract %3[0, 0, 0, 0] : f32 from vector<1x1x1x1xf32>
    %5 = arith.mulf %0, %0 : vector<1x4x16xf32>
    %6 = vector.shape_cast %5 : vector<1x4x16xf32> to vector<1x1x4x16xf32>
    %cst_2 = arith.constant dense<0.000000e+00> : vector<1xf32>
    %7 = vector.multi_reduction <add>, %6, %cst_2 [1, 2, 3] : vector<1x1x4x16xf32> to vector<1xf32>
    %8 = vector.shape_cast %7 : vector<1xf32> to vector<1x1x1x1xf32>
    %9 = vector.extract %8[0, 0, 0, 0] : f32 from vector<1x1x1x1xf32>
    %cst_3 = arith.constant 1.562500e-02 : f32
    %10 = arith.mulf %4, %cst_3 : f32
    %cst_4 = arith.constant 1.562500e-02 : f32
    %11 = arith.mulf %9, %cst_4 : f32
    %12 = arith.mulf %10, %10 : f32
    %13 = arith.subf %11, %12 : f32
    %cst_5 = arith.constant 0.000000e+00 : f32
    %14 = arith.maximumf %13, %cst_5 : f32
    %cst_6 = arith.constant 9.99999974E-6 : f32
    %15 = arith.addf %14, %cst_6 : f32
    %16 = math.rsqrt %15 : f32
    %c0_7 = arith.constant 0 : index
    %c0_8 = arith.constant 0 : index
    %17 = vector.load %arg2[%c0_7, %c0_8] : memref<4x1xf32, #tpu.memory_space<vmem>>, vector<4x1xf32>
    %18 = vector.shape_cast %17 : vector<4x1xf32> to vector<1x4x1xf32>
    %c0_9 = arith.constant 0 : index
    %c0_10 = arith.constant 0 : index
    %19 = vector.load %arg3[%c0_9, %c0_10] : memref<4x1xf32, #tpu.memory_space<vmem>>, vector<4x1xf32>
    %20 = vector.shape_cast %19 : vector<4x1xf32> to vector<1x4x1xf32>
    %21 = vector.broadcast %16 : f32 to vector<1x4x1xf32>
    %22 = arith.mulf %18, %21 : vector<1x4x1xf32>
    %23 = vector.broadcast %10 : f32 to vector<1x4x1xf32>
    %24 = arith.mulf %23, %22 : vector<1x4x1xf32>
    %25 = arith.subf %20, %24 : vector<1x4x1xf32>
    %26 = vector.broadcast %22 : vector<1x4x1xf32> to vector<1x4x16xf32>
    %27 = arith.mulf %0, %26 : vector<1x4x16xf32>
    %28 = vector.broadcast %25 : vector<1x4x1xf32> to vector<1x4x16xf32>
    %29 = arith.addf %27, %28 : vector<1x4x16xf32>
    %c0_11 = arith.constant 0 : index
    %c0_12 = arith.constant 0 : index
    %c0_13 = arith.constant 0 : index
    %30 = vector.load %arg4[%c0_11, %c0_12, %c0_13] : memref<1x4x16xf32, #tpu.memory_space<vmem>>, vector<1x4x16xf32>
    tpu.vector_store %arg4[%c0_11, %c0_12, %c0_13], %29 {strides = array<i32>} : memref<1x4x16xf32, #tpu.memory_space<vmem>>, vector<1x4x16xf32>,
    return
  }
  func.func @transform_0(%arg0: i32) -> (i32, i32, i32) {
    %c0_i32 = arith.constant 0 : i32
    %c0_i32_0 = arith.constant 0 : i32
    %c0_i32_1 = arith.constant 0 : i32
    return %arg0, %c0_i32, %c0_i32_0 : i32, i32, i32
  }
  func.func @transform_1(%arg0: i32) -> (i32, i32) {
    %c0_i32 = arith.constant 0 : i32
    %c0_i32_0 = arith.constant 0 : i32
    %c0_i32_1 = arith.constant 0 : i32
    return %c0_i32, %c0_i32_0 : i32, i32
  }
  func.func @transform_2(%arg0: i32) -> (i32, i32) {
    %c0_i32 = arith.constant 0 : i32
    %c0_i32_0 = arith.constant 0 : i32
    %c0_i32_1 = arith.constant 0 : i32
    return %c0_i32, %c0_i32_0 : i32, i32
  }
  func.func @transform_3(%arg0: i32) -> (i32, i32, i32) {
    %c0_i32 = arith.constant 0 : i32
    %c0_i32_0 = arith.constant 0 : i32
    %c0_i32_1 = arith.constant 0 : i32
    return %arg0, %c0_i32, %c0_i32_0 : i32, i32, i32
  }
}

</mosaic_0001>

<bundles_post_ra>
// kernel: tpu_custom_call.1
= control target key start
LH: loop header
LB: loop body
LE: loop exit
PB: predicated region body
PF: predicated region fallthrough
CT: control target
= control target key end

     0   :  { %8 = vsyncpa [#allocation3], 0  ;;  %s548_s0 = inlined_call_operand.vmem [shape: f32[2,4,16], index: 0, kind: input, shape index: {}]   ;;  %s549_s1 = inlined_call_operand.vmem [shape: f32[4,1], index: 1, kind: input, shape index: {}]   ;;  %s550_s2 = inlined_call_operand.vmem [shape: f32[4,1], index: 2, kind: input, shape index: {}]   ;;  %s551_s3 = inlined_call_operand.hbm [shape: f32[2,4,16], index: 3, kind: output, shape index: {}]  }
   0x1   :  { %10 = vsyncpa [#allocation3 + $0x1], 0  ;;  %s439_s12 = smov 0   ;;  %s441_s13 = smov 0  }
   0x2   :  { %s443_s14 = smov 0   ;;  %s445_s15 = smov 0  }
   0x3 LB: > { %s460_s16 = sadd.s32 4294967295, %s414_s15   ;;  %s291_s17 = sadd.s32 4294967294, %s414_s15   ;;  %s414_s15 = sphi %s445_s15, %s557_s15   ;;  %s410_s14 = sphi %s443_s14, %s556_s14   ;;  %s406_s13 = sphi %s441_s13, %s555_s13   ;;  %s402_s12 = sphi %s439_s12, %s554_s12  }
   0x4   : > { %s464_s18 = sadd.s32 1, %s414_s15   ;;  %s91_s19 = sadd.s32 1, %s410_s14 }
   0x5   : > { %s88_s20 = ssub.s32 %s414_s15, %s464_s18  ;;  %p101_p0 = scmp.ne.s32.totalorder %s410_s14, %s406_s13 }
   0x6   : > { %p89_p1 = scmp.eq.s32.totalorder %s88_s20, 0  ;;  %p102_p2 = scmp.eq.s32.totalorder %s460_s16, 1 }
   0x7   : > { %p107_p3 = scmp.ne.s32.totalorder %s406_s13, %s402_s12  ;;  %p108_p4 = scmp.eq.s32.totalorder %s291_s17, 1 }
   0x8   : > { %s475_s21 = scalar_select %p89_p1, %s410_s14, %s91_s19  }
   0x9   : > { %p477_p5 = por %p102_p2, %p101_p0  ;;  %p481_p6 = por %p108_p4, %p107_p3 }
   0xa   : > { %p294_p7 = scmp.ge.s32.totalorder %s414_s15, 1  ;;  %p139_p8 = scmp.lt.s32.totalorder %s414_s15, 3 }
   0xc   : > { %p140_p9 = pnand %p294_p7, %p139_p8 }
   0xd   : > { %p162_p10 = scmp.lt.s32.totalorder (!%p140_p9), %s460_s16, 1  ;;  %vm167_vm0 = vcmask (!%p140_p9), 125952   ;;  %v416_v14 = vmov (!%p140_p9), 0   ;;  %s417_s8 = smov (!%p140_p9), 0.0   ;;  %v198_v21 = vld [vmem:[%s549_s1] sm:$0xf] (!%p140_p9) }
   0xe   : > { %143 = sbr.rel (%p140_p9) target bundleno = 455 (0x1c7), region = 32  ;;  %348 = vset.pattern.permute.xlu1 (!%p140_p9), %v416_v14  ;;  %349 = vset.pattern.permute.xlu0 (!%p140_p9), %v416_v14  ;;  %v199_v25 = vld [vmem:[%s550_s2] sm:$0xf] (!%p140_p9)  ;;  %s298_s27 = sshll.u32 (!%p140_p9), %s460_s16, 6 }
  0x15   : > { %s163_s24 = scalar_select %p162_p10, %s460_s16, 1 }
  0x16   : > { %s418_s16 = smov [#allocation2]  }
  0x17   : > { %s296_s25 = sshll.u32 %s163_s24, 2 }
  0x18   : > { %s165_s28 = scalar_lea.vmem %s548_s0, %s296_s25  ;;  %s159_s25 = sand.u32 1, %s406_s13  }
  0x19   : > { %v166_v0 = vld [vmem:[%s165_s28] sm:$0xf]  ;;  %s295_s26 = sshll.u32 %s159_s25, 2 }
  0x1a   : > { %v168_v1 = vsel %vm167_vm0, %v166_v0, 0.0  ;;  %v178_v2 = vmul.f32 %v166_v0, %v166_v0  ;;  %s161_s28 = scalar_lea.vmem [#allocation2], %s295_s26 }
  0x1b   : > { %169 = vadd.xlane.f32.xlu0 %v168_v1 }
  0x1c   : > { %v179_v3 = vsel %vm167_vm0, %v178_v2, 0.0 }
  0x1f   : > { %180 = vadd.xlane.f32.xlu0 %v179_v3 }
  0xa8   : > { %v170_v4 = vpop.xlane.xlu0 %169 }
  0xa9   : > { %v171_v5 = vrot.slane %v170_v4, 4 }
  0xab   : > { %v172_v6 = vadd.f32 %v171_v5, %v170_v4 }
  0xac   : > { %v181_v7 = vpop.xlane.xlu0 %180 }
  0xad   : > { %v173_v8 = vrot.slane %v172_v6, 2  ;;  %v182_v9 = vrot.slane %v181_v7, 4 }
  0xaf   : > { %v183_v10 = vadd.f32 %v182_v9, %v181_v7  ;;  %v174_v11 = vadd.f32 %v173_v8, %v172_v6 }
  0xb1   : > { %v184_v12 = vrot.slane %v183_v10, 2  ;;  %v175_v13 = vrot.slane %v174_v11, 1 }
  0xb3   : > { %v185_v15 = vadd.f32 %v184_v12, %v183_v10  ;;  %v176_v16 = vadd.f32 %v175_v13, %v174_v11 }
  0xb5   : > { %301 = vpush %v176_v16  ;;  %v186_v17 = vrot.slane %v185_v15, 1 }
  0xb7   : > { %v187_v18 = vadd.f32 %v186_v17, %v185_v15 }
  0xb9   : > { %303 = vpush %v187_v18 }
  0xe6   : > { %s302_s29 = spop %301 }
  0xe7   : > { %s189_s30 = smul.f32 0.015625, %s302_s29  ;;  %s232_s29 = sshll.u32 %s161_s28, 4  ;;  %s507_s29 = int_to_ptr.vmem [resolvable:$true] %s232_s29 }
  0xe9   : > { %s191_s4 = smul.f32 %s189_s30, %s189_s30  ;;  %v202_v24 = vstv %s189_s30 }
  0xea   : > { %s304_s5 = spop %303 }
  0xeb   : > { %s190_s6 = smul.f32 0.015625, %s304_s5  ;;  %s505_s5 = scalar_lea.hbm %s551_s3, %s298_s27 }
  0xed   : > { %s192_s7 = ssub.f32 %s190_s6, %s191_s4  ;;  %s219_s6 = scalar_lea.sflag [#allocation3], %s159_s25 }
  0xef   : > { %s193_s9 = smax.f32 %s417_s8, %s192_s7  ;;  %s352_s7 = scalar_lea.vmem %s507_s29, 64 }
  0xf0   : > { %s194_s10 = sadd.f32 1e-05, %s193_s9  ;;  %p353_p11 = scmp.ne.s32.totalorder %s507_s29, %s352_s7 }
  0xf1   : > { %s356_s8 = sshll.u32 %s418_s16, 4  ;;  %s357_s8 = int_to_ptr.vmem [resolvable:$false] %s356_s8 }
  0xf2   : > { %v195_v19 = vstv %s194_s10  ;;  %p354_p12 = pnand %p353_p11, %p477_p5  ;;  %s358_s9 = scalar_lea.vmem %s357_s8, 128 }
  0xf3   : > { %350 = vrsqrt.f32 %v195_v19  ;;  %p359_p0 = scmp.lt.s32.totalorder %s507_s29, %s357_s8  ;;  %p360_p1 = scmp.lt.s32.totalorder %s358_s9, %s352_s7 }
  0xf4   : > { %p355_p13 = pneg %p354_p12 }
  0xf5   : > { %p361_p2 = por %p360_p1, %p359_p0 }
  0xf7   : > { %p362_p3 = pnand %p361_p2, %p355_p13 }
  0xfd   : > { %v351_v20 = vpop.eup %350 }
  0xfe   : > { %305 = vpush %v351_v20 }
 0x12f   : > { %s306_s19 = spop %305 }
 0x130   : > { %v200_v22 = vstv %s306_s19 }
 0x131   : > { %v201_v23 = vmul.f32 %v200_v22, %v198_v21 }
 0x133   : > { %v203_v26 = vmul.f32 %v202_v24, %v201_v23  ;;  %207 = vperm.xlu1 %348, %v201_v23  }
 0x135   : > { %v204_v27 = vsub.f32 %v199_v25, %v203_v26 }
 0x137   : > { %213 = vperm.xlu1 %348, %v204_v27  }
 0x1b2   : > { %v208_v28 = vpop.permute.xlu1 %207 }
 0x1b3   : > { %v210_v29 = vmul.f32 %v208_v28, %v166_v0 }
 0x1b6   : > { %v214_v30 = vpop.permute.xlu1 %213 }
 0x1b7   : > { %v216_v31 = vadd.f32 %v214_v30, %v210_v29 }
 0x1b9   : > { %217 = vst.msk [vmem:[%s161_s28] sm:$0xf] %vm167_vm0, %v216_v31 }
 0x1ba   : > { %365 = shalt.err (!%p362_p3)
}
 0x1bb   : > { %s366_s10 = scalar_lea.hbm %s505_s5, 64  ;;  %s370_s19 = scalar_lea.hbm %s551_s3, 128 }
 0x1bc   : > { %p367_p4 = scmp.ne.s32.totalorder %s505_s5, %s366_s10  ;;  %p371_p9 = scmp.lt.u32.totalorder %s505_s5, %s551_s3 }
 0x1bd   : > { %p372_p10 = scmp.lt.u32.totalorder %s370_s19, %s366_s10  ;;  %p374_p12 = scmp.lt.u32.totalorder %s366_s10, %s505_s5 }
 0x1be   : > { %p368_p7 = pnand %p367_p4, %p477_p5 }
 0x1bf   : > { %p373_p11 = por %p372_p10, %p371_p9 }
 0x1c0   : > { %p369_p8 = pneg %p368_p7 }
 0x1c1   : > { %p375_p13 = por %p374_p12, %p373_p11 }
 0x1c3   : > { %p376_p0 = pnand %p375_p13, %p369_p8 }
 0x1c5   : > { %379 = shalt.err (!%p376_p0)
}
 0x1c6   : > { %307 = dma.vmem_to_hbm [thread:$0]  (%p477_p5), %s507_s29, 64, %s505_s5, %s219_s6  }
 0x1c7 PF: > { %p313_p1 = scmp.ge.s32.totalorder %s414_s15, 2  ;;  %s244_s25 = sand.u32 1, %s402_s12  }
 0x1c8   : > { %s245_s26 = scalar_lea.sflag [#allocation3], %s244_s25 }
 0x1c9   : > { %p310_p2 = pnand %p313_p1, %p481_p6 }
 0x1cb   : > { %397 = dma.done.wait (!%p310_p2), %s245_s26, 64  }
 0x1cc   : > { %399 = vsyncadd (!%p310_p2), %s245_s26, 4294967232  ;;  %p13_p3 = scmp.ge.s32.totalorder %s464_s18, 4   ;;  %s554_s12 = smov %s406_s13 }
 0x1cd   : > { %s555_s13 = smov %s410_s14  ;;  %s556_s14 = smov %s475_s21 }
 0x1ce   : > { %s557_s15 = smov %s464_s18  ;;  %15 = sbr.rel (!%p13_p3) target bundleno = 3 (0x3), region = 67 }
 0x1d5   :  { %250 = vsyncpa [#allocation3], 1 }
 0x1d6   :  { %252 = vsyncpa [#allocation3 + $0x1], 1 }

</bundles_post_ra>
